<compile_context>
chip_gen: v7x
topology: tpu7x:2x2x1
jax: 0.10.0
libtpu: 0.0.40
codegen_flags: <defaults>
</compile_context>

<pallas_src>
import jax
import jax.numpy as jnp
from jax.experimental import pallas as pl
from jax.experimental.pallas import tpu as pltpu


def _temporal_kernel(xp_ref, w_ref, b_ref, o_ref):
    # xp_ref: (Bb, T+2, F) time-padded input block
    # w_ref : (3F, O_out) fused tap weights    b_ref: (1, O_out) bias
    # o_ref : (Bb, T, O_out)
    Bb, Tp2, F = xp_ref.shape
    T = Tp2 - 2
    O_out = o_ref.shape[-1]

    xp = xp_ref[...]                                    # (Bb, T+2, F)
    x_prev = xp[:, 0:T, :]                              # x[t-1]  (tap k=0)
    x_cur = xp[:, 1:T + 1, :]                           # x[t]    (tap k=1)
    x_next = xp[:, 2:T + 2, :]                          # x[t+1]  (tap k=2)

    # im2col: (Bb, T, 3F) -> (Bb*T, 3F) so one MXU matmul covers all 3 taps.
    xcat = jnp.concatenate([x_prev, x_cur, x_next], axis=-1)
    xcat = xcat.reshape(Bb * T, 3 * F)

    acc = jnp.dot(xcat, w_ref[...], preferred_element_type=jnp.float32)
    acc += b_ref[...]                                   # (1, O_out) broadcasts
    out = jnp.maximum(acc, 0.0).astype(o_ref.dtype)
    o_ref[...] = out.reshape(Bb, T, O_out)


def _round_up(n, m):
    return ((n + m - 1) // m) * m


def _pick_batch_block(B, T, F, O_out, budget_bytes=6 * 1024 * 1024):
    """Largest divisor of B whose per-step VMEM footprint fits the budget."""
    # f32 bytes per batch row held live in VMEM:
    #   double-buffered I/O blocks : 2 * ((T+2)*F + T*O_out)
    #   im2col slab + f32 acc      : 3*T*F + T*O_out
    per_batch = 4 * (2 * ((T + 2) * F + T * O_out) + 3 * T * F + T * O_out)
    bb = max(1, min(B, budget_bytes // max(per_batch, 1)))
    while B % bb != 0:
        bb -= 1
    return bb


def temporal_forward(x, weight, bias):
    """x: (B, T, F) f32; weight: (out_len, F, 3); bias: (out_len,) -> (B, T, out_len)."""
    B, T, F = x.shape
    O = weight.shape[0]

    # Lane-dense output channels only when write amplification stays <= 2x;
    # otherwise store the exact width (contiguous HBM writes, no slice pass).
    O_pad = _round_up(O, 128)
    O_out = O_pad if O_pad <= 2 * O else O

    # Time halo in the wrapper: kernel output row t reads xp[t : t+3].
    xp = jnp.pad(x, ((0, 0), (1, 1), (0, 0)))            # (B, T+2, F)

    # Fuse the 3 conv taps along K: [w(:,:,0); w(:,:,1); w(:,:,2)] -> (3F, O_out).
    w_fused = jnp.concatenate(
        [jnp.transpose(weight[:, :, k]) for k in range(3)], axis=0)   # (3F, O)
    w_fused = jnp.pad(w_fused, ((0, 0), (0, O_out - O))).astype(x.dtype)
    b_out = jnp.pad(bias, (0, O_out - O)).astype(jnp.float32).reshape(1, O_out)

    Bb = _pick_batch_block(B, T, F, O_out)
    grid = (B // Bb,)

    out = pl.pallas_call(
        _temporal_kernel,
        out_shape=jax.ShapeDtypeStruct((B, T, O_out), x.dtype),
        grid_spec=pltpu.PrefetchScalarGridSpec(
            num_scalar_prefetch=0,
            grid=grid,
            in_specs=[
                pl.BlockSpec((Bb, T + 2, F), lambda b: (b, 0, 0)),
                pl.BlockSpec((3 * F, O_out), lambda b: (0, 0)),   # VMEM-resident
                pl.BlockSpec((1, O_out), lambda b: (0, 0)),       # VMEM-resident
            ],
            out_specs=pl.BlockSpec((Bb, T, O_out), lambda b: (b, 0, 0)),
        ),
        compiler_params=pltpu.CompilerParams(
            dimension_semantics=("parallel",)),
    )(xp, w_fused, b_out)

    return out[:, :, :O] if O_out != O else out


def temporal_reference(x, weight, bias):
    """Pure-JAX reference of Conv1d(k=3, pad=1) + ReLU in (B, T, F) layout."""
    B, T, F = x.shape
    xp = jnp.pad(x, ((0, 0), (1, 1), (0, 0)))
    out = jnp.zeros((B, T, weight.shape[0]), jnp.float32)
    for k in range(3):
        out = out + jnp.einsum("btf,of->bto", xp[:, k:k + T, :], weight[:, :, k])
    return jnp.maximum(out + bias[None, None, :], 0.0).astype(x.dtype)


if __name__ == "__main__":
    B, T, dfeat, out_len = 2, 8, 32, 16

    key = jax.random.PRNGKey(0)
    kx, kw, kb = jax.random.split(key, 3)

    x = jax.random.normal(kx, (B, T, dfeat), dtype=jnp.float32)

    # Conv1d-style init: uniform(-bound, bound), bound = 1/sqrt(dfeat * kernel_size)
    bound = 1.0 / jnp.sqrt(jnp.float32(dfeat * 3))
    weight = jax.random.uniform(kw, (out_len, dfeat, 3), jnp.float32, -bound, bound)
    bias = jax.random.uniform(kb, (out_len,), jnp.float32, -bound, bound)

    y = temporal_forward(x, weight, bias)
    y = jax.block_until_ready(y)

    y_ref = temporal_reference(x, weight, bias)
    assert y.shape == (B, T, out_len)
    assert jnp.allclose(y, y_ref, atol=1e-5, rtol=1e-5), "mismatch vs reference"

    print("KERNEL_OK")
</pallas_src>

<mosaic_0001>
module attributes {stable_mosaic.version = 11 : i64} {
  func.func @_temporal_kernel(%arg0: i32, %arg1: memref<2x10x32xf32, #tpu.memory_space<vmem>>, %arg2: memref<96x16xf32, #tpu.memory_space<vmem>>, %arg3: memref<1x16xf32, #tpu.memory_space<vmem>>, %arg4: memref<2x8x16xf32, #tpu.memory_space<vmem>>) attributes {dimension_semantics = [#tpu.dimension_semantics<parallel>], iteration_bounds = array<i64: 1>, scalar_prefetch = 0 : i64, scratch_operands = 0 : i64, tpu.core_type = #tpu.core_type<tc>, window_params = [{transform_indices = @transform_0, window_bounds = array<i64: 2, 10, 32>}, {pipeline_mode = #tpu.pipeline_mode<synchronous>, transform_indices = @transform_1, window_bounds = array<i64: 96, 16>}, {pipeline_mode = #tpu.pipeline_mode<synchronous>, transform_indices = @transform_2, window_bounds = array<i64: 1, 16>}, {transform_indices = @transform_3, window_bounds = array<i64: 2, 8, 16>}]} {
    %c0 = arith.constant 0 : index
    %c0_0 = arith.constant 0 : index
    %c0_1 = arith.constant 0 : index
    %0 = vector.load %arg1[%c0, %c0_0, %c0_1] : memref<2x10x32xf32, #tpu.memory_space<vmem>>, vector<2x10x32xf32>
    %1 = vector.extract_strided_slice %0 {offsets = [0, 0, 0], sizes = [2, 8, 32], strides = [1, 1, 1]} : vector<2x10x32xf32> to vector<2x8x32xf32>
    %2 = vector.extract_strided_slice %0 {offsets = [0, 1, 0], sizes = [2, 8, 32], strides = [1, 1, 1]} : vector<2x10x32xf32> to vector<2x8x32xf32>
    %3 = vector.extract_strided_slice %0 {offsets = [0, 2, 0], sizes = [2, 8, 32], strides = [1, 1, 1]} : vector<2x10x32xf32> to vector<2x8x32xf32>
    %4 = tpu.concatenate %1, %2, %3 in 2 : vector<2x8x32xf32>, vector<2x8x32xf32>, vector<2x8x32xf32> -> vector<2x8x96xf32>
    %5 = vector.shape_cast %4 : vector<2x8x96xf32> to vector<16x96xf32>
    %c0_2 = arith.constant 0 : index
    %c0_3 = arith.constant 0 : index
    %6 = vector.load %arg2[%c0_2, %c0_3] : memref<96x16xf32, #tpu.memory_space<vmem>>, vector<96x16xf32>
    %cst = arith.constant dense<0.000000e+00> : vector<16x16xf32>
    %7 = tpu.matmul %5, %6, %cst {dimension_numbers = #tpu.dot_dimension_numbers<[1], [0], [0], [1], [0, 0, 1, 1], [], []>} : vector<16x96xf32>, vector<96x16xf32>, vector<16x16xf32> -> vector<16x16xf32>
    %c0_4 = arith.constant 0 : index
    %c0_5 = arith.constant 0 : index
    %8 = vector.load %arg3[%c0_4, %c0_5] : memref<1x16xf32, #tpu.memory_space<vmem>>, vector<1x16xf32>
    %9 = vector.broadcast %8 : vector<1x16xf32> to vector<16x16xf32>
    %10 = arith.addf %7, %9 : vector<16x16xf32>
    %cst_6 = arith.constant 0.000000e+00 : f32
    %11 = vector.broadcast %cst_6 : f32 to vector<16x16xf32>
    %12 = arith.maximumf %10, %11 : vector<16x16xf32>
    %13 = vector.shape_cast %12 : vector<16x16xf32> to vector<2x8x16xf32>
    %c0_7 = arith.constant 0 : index
    %c0_8 = arith.constant 0 : index
    %c0_9 = arith.constant 0 : index
    %14 = vector.load %arg4[%c0_7, %c0_8, %c0_9] : memref<2x8x16xf32, #tpu.memory_space<vmem>>, vector<2x8x16xf32>
    tpu.vector_store %arg4[%c0_7, %c0_8, %c0_9], %13 {strides = array<i32>} : memref<2x8x16xf32, #tpu.memory_space<vmem>>, vector<2x8x16xf32>,
    return
  }
  func.func @transform_0(%arg0: i32) -> (i32, i32, i32) {
    %c0_i32 = arith.constant 0 : i32
    %c0_i32_0 = arith.constant 0 : i32
    %c0_i32_1 = arith.constant 0 : i32
    return %arg0, %c0_i32, %c0_i32_0 : i32, i32, i32
  }
  func.func @transform_1(%arg0: i32) -> (i32, i32) {
    %c0_i32 = arith.constant 0 : i32
    %c0_i32_0 = arith.constant 0 : i32
    %c0_i32_1 = arith.constant 0 : i32
    return %c0_i32, %c0_i32_0 : i32, i32
  }
  func.func @transform_2(%arg0: i32) -> (i32, i32) {
    %c0_i32 = arith.constant 0 : i32
    %c0_i32_0 = arith.constant 0 : i32
    %c0_i32_1 = arith.constant 0 : i32
    return %c0_i32, %c0_i32_0 : i32, i32
  }
  func.func @transform_3(%arg0: i32) -> (i32, i32, i32) {
    %c0_i32 = arith.constant 0 : i32
    %c0_i32_0 = arith.constant 0 : i32
    %c0_i32_1 = arith.constant 0 : i32
    return %arg0, %c0_i32, %c0_i32_0 : i32, i32, i32
  }
}

</mosaic_0001>

<bundles_post_ra>
// kernel: tpu_custom_call.1
= control target key start
LH: loop header
LB: loop body
LE: loop exit
PB: predicated region body
PF: predicated region fallthrough
CT: control target
= control target key end

     0   :  { %vm23_vm0 = vcmask 1046528   ;;  %vm36_vm1 = vcmask 1045504   ;;  %s274_s27 = smov 32   ;;  %s275_s28 = smov 64   ;;  %s366_s0 = inlined_call_operand.vmem [shape: f32[2,10,32], index: 0, kind: input, shape index: {}]   ;;  %s367_s1 = inlined_call_operand.vmem [shape: f32[96,16], index: 1, kind: input, shape index: {}]   ;;  %s368_s2 = inlined_call_operand.vmem [shape: f32[1,16], index: 2, kind: input, shape index: {}]   ;;  %s369_s3 = inlined_call_operand.hbm [shape: f32[2,8,16], index: 3, kind: output, shape index: {}]  }
   0x1   :  { %v15_v0 = vld [vmem:[%s366_s0] sm:$0xff]  ;;  %v16_v1 = vld [vmem:[%s366_s0 + $0x8] sm:$0x3]  ;;  %v17_v6 = vld [vmem:[%s366_s0 + $0x10] sm:$0xff] }
   0x2   :  { %v24_v2 = vrot.slane %v15_v0, 1  ;;  %v25_v3 = vrot.slane %v16_v1, 1  ;;  %v37_v4 = vrot.slane %v15_v0, 2  ;;  %v38_v5 = vrot.slane %v16_v1, 2  ;;  %v18_v7 = vld [vmem:[%s366_s0 + $0x18] sm:$0x3] }
   0x3   :  { %v27_v8 = vrot.slane %v17_v6, 1  ;;  %v40_v9 = vrot.slane %v17_v6, 2  ;;  %v55_v10 = vld [vmem:[%s367_s1] sm:$0xff]  ;;  %v56_v11 = vld [vmem:[%s367_s1 + $0x8] sm:$0xff]  ;;  %v28_v14 = vrot.slane %v18_v7, 1  ;;  %v41_v15 = vrot.slane %v18_v7, 2 }
   0x4   :  { %v26_v12 = vsel %vm23_vm0, %v24_v2, %v25_v3  ;;  %v39_v13 = vsel %vm36_vm1, %v37_v4, %v38_v5  ;;  %v57_v16 = vld [vmem:[%s367_s1 + $0x10] sm:$0xff]  ;;  %v58_v17 = vld [vmem:[%s367_s1 + $0x18] sm:$0xff]  ;;  %v221_v18 = vpack.c.bf16 %v56_v11, %v55_v10  ;;  %v59_v22 = vld [vmem:[%s367_s1 + $0x20] sm:$0xff] }
   0x5   :  { %30 = vrot.lane.b32.xlu0 %v26_v12, %s274_s27  ;;  %43 = vrot.lane.b32.xlu1 %v39_v13, %s275_s28  ;;  %v29_v19 = vsel %vm23_vm0, %v27_v8, %v28_v14  ;;  %v42_v20 = vsel %vm36_vm1, %v40_v9, %v41_v15  ;;  %v225_v21 = vpack.c.bf16 %v58_v17, %v57_v16  ;;  %v60_v23 = vld [vmem:[%s367_s1 + $0x28] sm:$0xff] }
   0x6   :  { %222 = vmatprep.subr.bf16.mxu0 %v221_v18 }
   0x7   :  { %8 = vsyncpa [#allocation3], 0  ;;  %224 = vmatpush3.bf16.msra.mxu0 %v221_v18  ;;  %v229_v24 = vpack.c.bf16 %v60_v23, %v59_v22  ;;  %v61_v25 = vld [vmem:[%s367_s1 + $0x30] sm:$0xff]  ;;  %v62_v26 = vld [vmem:[%s367_s1 + $0x38] sm:$0xff]  ;;  %vm49_vm2 = vcmask 261120   ;;  %vm52_vm3 = vcmask 523264  }
   0x8   :  { %226 = vmatprep.subr.bf16.mxu0 %v225_v21  ;;  %v233_v27 = vpack.c.bf16 %v62_v26, %v61_v25  ;;  %v63_v28 = vld [vmem:[%s367_s1 + $0x40] sm:$0xff]  ;;  %v64_v29 = vld [vmem:[%s367_s1 + $0x48] sm:$0xff]  ;;  %v65_v31 = vld [vmem:[%s367_s1 + $0x50] sm:$0xff]  ;;  %vm74_vm4 = vcmask 785408   ;;  %s276_s19 = smov [#allocation2]   ;;  %vm158_vm5 = vcmask 130048  }
   0x9   :  { %32 = vrot.lane.b32.xlu0 %v29_v19, %s274_s27  ;;  %45 = vrot.lane.b32.xlu1 %v42_v20, %s275_s28  ;;  %v237_v30 = vpack.c.bf16 %v64_v29, %v63_v28  ;;  %v66_v32 = vld [vmem:[%s367_s1 + $0x58] sm:$0xff]  ;;  %v177_v42 = vld [vmem:[%s368_s2] ss:$0 sm:$0xff]  ;;  %s166_s20 = sshll.u32 %s276_s19, 4  ;;  %s167_s20 = int_to_ptr.vmem [resolvable:$true] %s166_s20 }
   0xa   :  { %v241_v33 = vpack.c.bf16 %v66_v32, %v65_v31  ;;  %s250_s21 = scalar_lea.vmem %s167_s20, 256  ;;  %p255_p1 = scmp.lt.s32.totalorder %s167_s20, %s167_s20 }
   0xb   :  { %228 = vmatpush3.bf16.msra.mxu0 %v225_v21  ;;  %p251_p0 = scmp.ne.s32.totalorder %s167_s20, %s250_s21  ;;  %p256_p2 = scmp.lt.s32.totalorder %s250_s21, %s250_s21 }
   0xc   :  { %230 = vmatprep.subr.bf16.mxu0 %v229_v24 }
   0xd   :  { %p257_p3 = por %p256_p2, %p255_p1 }
   0xf   :  { %232 = vmatpush3.bf16.msra.mxu0 %v229_v24  ;;  %p258_p4 = pnand %p257_p3, %p251_p0 }
  0x10   :  { %234 = vmatprep.subr.bf16.mxu0 %v233_v27 }
  0x13   :  { %236 = vmatpush3.bf16.msra.mxu0 %v233_v27 }
  0x14   :  { %238 = vmatprep.subr.bf16.mxu0 %v237_v30 }
  0x17   :  { %240 = vmatpush3.bf16.msra.mxu0 %v237_v30 }
  0x18   :  { %242 = vmatprep.subr.bf16.mxu0 %v241_v33 }
  0x1b   :  { %244 = vmatpush3.bf16.msra.mxu0 %v241_v33 }
  0x77   :  { %v31_v34 = vpop.permute.xlu0 %30  ;;  %v44_v35 = vpop.permute.xlu1 %43 }
  0x78   :  { %v50_v36 = vsel %vm49_vm2, %v15_v0, %v31_v34 }
  0x79   :  { %v53_v37 = vsel %vm52_vm3, %v50_v36, %v44_v35 }
  0x7a   :  { %218 = vmatprep.mubr.msk.f32.mxu0 %vm74_vm4, %v53_v37 }
  0x7b   :  { %v33_v38 = vpop.permute.xlu0 %32  ;;  %v46_v39 = vpop.permute.xlu1 %45 }
  0x7c   :  { %v51_v40 = vsel %vm49_vm2, %v17_v6, %v33_v38 }
  0x7d   :  { %v54_v41 = vsel %vm52_vm3, %v51_v40, %v46_v39 }
  0x7e   :  { %219 = vmatmul.mubr.msk.f32.vlgmr.msra.gmra.mrb[0].mxu0 %vm74_vm4, %v54_v41 }
 0x151   :  { %v220_v43 = vpop.f32.mrb[0].mxu0 }
 0x152   :  { %v153_v44 = vadd.f32 %v220_v43, %v177_v42  ;;  %v147_v45 = vpop.f32.mrb[1].mxu0 }
 0x153   :  { %v148_v46 = vadd.f32 %v177_v42, %v147_v45 }
 0x154   :  { %v157_v47 = vmax.f32 %v153_v44, 0.0 }
 0x155   :  { %v156_v48 = vmax.f32 %v148_v46, 0.0 }
 0x156   :  { %160 = vst.msk [vmem:[#allocation2 + $0x8] sm:$0xff] %vm158_vm5, %v157_v47 }
 0x157   :  { %159 = vst.msk [vmem:[#allocation2] sm:$0xff] %vm158_vm5, %v156_v48 }
 0x158   :  { %261 = shalt.err (!%p258_p4)
}
 0x159   :  { %s262_s23 = scalar_lea.hbm %s369_s3, 256 }
 0x15a   :  { %p263_p5 = scmp.ne.s32.totalorder %s369_s3, %s262_s23  ;;  %p266_p6 = scmp.lt.u32.totalorder %s262_s23, %s369_s3 }
 0x15c   :  { %p268_p7 = pnand %p266_p6, %p263_p5 }
 0x15e   :  { %271 = shalt.err (!%p268_p7)
}
 0x15f   :  { %s277_s27 = smov 128   ;;  %s278_s28 = smov 8  }
 0x160   :  { %172 = dma.vmem_to_hbm [thread:$0]  %s167_s20, 256, %s369_s3, [#allocation3], %s277_s27, %s277_s27, %s278_s28  }
 0x161   :  { %272 = dma.done.wait [#allocation3], 256  }
 0x162   :  { %273 = vsyncadd [#allocation3], 4294967040 }
 0x163   :  { %176 = vsyncpa [#allocation3], 1 }

</bundles_post_ra>
